<compile_context>
chip_gen: v6e
topology: v6e:2x2x1
jax: 0.10.0
libtpu: 0.0.40
codegen_flags: <defaults>
</compile_context>

<pallas_src>
import functools

import jax
import jax.numpy as jnp
from jax.experimental import pallas as pl
from jax.experimental.pallas import tpu as pltpu

_LANE = 128
_TARGET_BLOCK_BYTES = 8 * 1024 * 1024      # per block buffer (review: 4-8 MiB)
_SPLIT_THRESHOLD_BYTES = 2 * 1024 * 1024   # force >=2 grid steps above this (v7x dual-TC)
_VMEM_LIMIT_CAP = 48 * 1024 * 1024         # headroom vs v7x's 64 MiB physical VMEM


def _hard_silu_kernel(x_ref, o_ref, *, compute_dtype):
    x = x_ref[...].astype(compute_dtype)
    three = jnp.asarray(3.0, compute_dtype)
    sixth = jnp.asarray(1.0 / 6.0, compute_dtype)
    y = x * jnp.clip((x + three) * sixth, 0, 1)
    o_ref[...] = y.astype(o_ref.dtype)


def _compute_dtype_for(dtype):
    """bf16 VALU exists on v6e/v7x: keep packed compute there, upcast elsewhere."""
    if dtype == jnp.float32:
        return jnp.float32
    if dtype == jnp.bfloat16:
        try:
            kind = jax.devices()[0].device_kind.lower()
        except Exception:
            kind = ""
        if kind and not any(old in kind for old in ("v2", "v3", "v4", "v5")):
            return jnp.bfloat16
    return jnp.float32


def _run_2d(x2d, *, donate=False):
    rows, width = x2d.shape
    dtype = x2d.dtype
    elem_bytes = dtype.itemsize
    total_bytes = rows * width * elem_bytes

    # Dtype-aware sublane multiple: (8,128) f32, (16,128) bf16, (32,128) int8/fp8.
    sub_mult = max(8, 32 // elem_bytes)

    max_rows = max(
        sub_mult,
        (_TARGET_BLOCK_BYTES // (width * elem_bytes)) // sub_mult * sub_mult,
    )

    if rows <= max_rows:
        if total_bytes > _SPLIT_THRESHOLD_BYTES and rows > sub_mult:
            # Mid-size tensor: split into >=2 blocks so both v7x TCs get work.
            half = -(-rows // 2)
            block_rows = -(-half // sub_mult) * sub_mult
            if block_rows >= rows:
                block_rows = rows
        else:
            block_rows = rows  # full first dim => exempt from /sub_mult divisibility
    else:
        block_rows = max_rows  # multiple of sub_mult; ragged tail block is masked

    block_bytes = block_rows * width * elem_bytes
    vmem_limit = min(
        _VMEM_LIMIT_CAP,
        max(32 * 1024 * 1024, 4 * block_bytes + (4 << 20)),
    )

    grid = (pl.cdiv(rows, block_rows),)
    kernel = functools.partial(
        _hard_silu_kernel, compute_dtype=_compute_dtype_for(dtype)
    )

    return pl.pallas_call(
        kernel,
        out_shape=jax.ShapeDtypeStruct((rows, width), dtype),
        grid=grid,
        in_specs=[pl.BlockSpec((block_rows, width), lambda i: (i, 0))],
        out_specs=pl.BlockSpec((block_rows, width), lambda i: (i, 0)),
        compiler_params=pltpu.CompilerParams(
            dimension_semantics=("parallel",),  # elementwise -> megacore-safe
            vmem_limit_bytes=vmem_limit,
        ),
        cost_estimate=pl.CostEstimate(
            flops=5 * rows * width,
            transcendentals=0,
            bytes_accessed=2 * rows * width * elem_bytes,
        ),
        input_output_aliases={0: 0} if donate else {},
    )(x2d)


def hard_silu(x, *, donate=False):
    """Apply HardSiLU to a tensor of any shape via a Pallas TPU kernel."""
    orig_shape = x.shape
    dtype = x.dtype
    total = x.size
    if total == 0:
        return x

    x_flat = x.reshape(-1)

    # Widest lane dimension that divides the flat size exactly -> no pad copy.
    width = None
    for cand in (4096, 2048, 1024, 512, 256, 128):
        if total % cand == 0:
            width = cand
            break

    if width is not None:
        out2d = _run_2d(x_flat.reshape(total // width, width), donate=donate)
        return out2d.reshape(orig_shape)

    # Ragged size: kernel on the 128-aligned prefix, tiny (<128 elem) tail in
    # plain jnp. Avoids the full pad-concatenate + output-slice HBM passes.
    main = (total // _LANE) * _LANE
    parts = []
    if main:
        y_main = _run_2d(x_flat[:main].reshape(main // _LANE, _LANE))
        parts.append(y_main.reshape(-1))
    tail = x_flat[main:]
    if tail.size:
        t32 = tail.astype(jnp.float32)
        parts.append(
            (t32 * jnp.clip((t32 + 3.0) * (1.0 / 6.0), 0.0, 1.0)).astype(dtype)
        )
    out_flat = parts[0] if len(parts) == 1 else jnp.concatenate(parts)
    return out_flat.reshape(orig_shape)


if __name__ == "__main__":
    key = jax.random.PRNGKey(0)
    # Small NCHW input, matching the PyTorch conv-feature convention.
    x = jax.random.normal(key, (2, 4, 16, 16), dtype=jnp.float32)

    y = jax.block_until_ready(hard_silu(x))
    ref = x * jnp.clip((x + 3.0) / 6.0, 0.0, 1.0)
    assert y.shape == x.shape and y.dtype == x.dtype
    assert jnp.allclose(y, ref, atol=1e-6, rtol=1e-6)

    # Ragged element count exercises the aligned-prefix + jnp-tail fallback.
    x2 = jax.random.normal(jax.random.PRNGKey(1), (3, 5, 7, 11), dtype=jnp.float32)
    y2 = jax.block_until_ready(hard_silu(x2))
    ref2 = x2 * jnp.clip((x2 + 3.0) / 6.0, 0.0, 1.0)
    assert y2.shape == x2.shape
    assert jnp.allclose(y2, ref2, atol=1e-6, rtol=1e-6)

    # bf16 path (native bf16 compute on v6e/v7x, f32 upcast on v5e/older).
    x3 = jax.random.normal(jax.random.PRNGKey(2), (2, 8, 16, 16), dtype=jnp.bfloat16)
    y3 = jax.block_until_ready(hard_silu(x3))
    x3f = x3.astype(jnp.float32)
    ref3 = x3f * jnp.clip((x3f + 3.0) / 6.0, 0.0, 1.0)
    assert y3.dtype == jnp.bfloat16 and y3.shape == x3.shape
    assert jnp.allclose(y3.astype(jnp.float32), ref3, atol=0.1, rtol=0.05)

    print("KERNEL_OK")
</pallas_src>

<mosaic_0001>
module attributes {stable_mosaic.version = 11 : i64} {
  func.func @_hard_silu_kernel(%arg0: i32, %arg1: memref<1x2048xf32, #tpu.memory_space<vmem>>, %arg2: memref<1x2048xf32, #tpu.memory_space<vmem>>) attributes {dimension_semantics = [#tpu.dimension_semantics<parallel>], iteration_bounds = array<i64: 1>, scalar_prefetch = 0 : i64, scratch_operands = 0 : i64, tpu.core_type = #tpu.core_type<tc>, window_params = [{transform_indices = @transform_0, window_bounds = array<i64: 1, 2048>}, {transform_indices = @transform_1, window_bounds = array<i64: 1, 2048>}]} {
    %c0 = arith.constant 0 : index
    %c0_0 = arith.constant 0 : index
    %0 = vector.load %arg1[%c0, %c0_0] : memref<1x2048xf32, #tpu.memory_space<vmem>>, vector<1x2048xf32>
    %cst = arith.constant 3.000000e+00 : f32
    %1 = vector.broadcast %cst : f32 to vector<1x2048xf32>
    %2 = arith.addf %0, %1 : vector<1x2048xf32>
    %cst_1 = arith.constant 0.166666672 : f32
    %3 = vector.broadcast %cst_1 : f32 to vector<1x2048xf32>
    %4 = arith.mulf %2, %3 : vector<1x2048xf32>
    %c0_i32 = arith.constant 0 : i32
    %c1_i32 = arith.constant 1 : i32
    %5 = arith.sitofp %c0_i32 : i32 to f32
    %6 = vector.broadcast %5 : f32 to vector<1x2048xf32>
    %7 = arith.maximumf %6, %4 : vector<1x2048xf32>
    %8 = arith.sitofp %c1_i32 : i32 to f32
    %9 = vector.broadcast %8 : f32 to vector<1x2048xf32>
    %10 = arith.minimumf %9, %7 : vector<1x2048xf32>
    %11 = arith.mulf %0, %10 : vector<1x2048xf32>
    %c0_2 = arith.constant 0 : index
    %c0_3 = arith.constant 0 : index
    %12 = vector.load %arg2[%c0_2, %c0_3] : memref<1x2048xf32, #tpu.memory_space<vmem>>, vector<1x2048xf32>
    tpu.vector_store %arg2[%c0_2, %c0_3], %11 {strides = array<i32>} : memref<1x2048xf32, #tpu.memory_space<vmem>>, vector<1x2048xf32>,
    return
  }
  func.func @transform_0(%arg0: i32) -> (i32, i32) {
    %c0_i32 = arith.constant 0 : i32
    %c0_i32_0 = arith.constant 0 : i32
    return %arg0, %c0_i32 : i32, i32
  }
  func.func @transform_1(%arg0: i32) -> (i32, i32) {
    %c0_i32 = arith.constant 0 : i32
    %c0_i32_0 = arith.constant 0 : i32
    return %arg0, %c0_i32 : i32, i32
  }
}

</mosaic_0001>

<bundles_post_ra>
// kernel: tpu_custom_call.1
= control target key start
LH: loop header
LB: loop body
LE: loop exit
PB: predicated region body
PF: predicated region fallthrough
CT: control target
= control target key end

     0   :  { %6 = vsyncpa [#allocation3], 0  ;;  %s114_s0 = inlined_call_operand.hbm [shape: f32[1,2048], index: 0, kind: input, shape index: {}]   ;;  %s115_s1 = inlined_call_operand.hbm [shape: f32[1,2048], index: 1, kind: output, shape index: {}]  }
   0x1   :  { %7 = vsyncpa [#allocation4], 0  ;;  %s96_s6 = smov [#allocation2]  }
   0x2   :  { %s14_s7 = sshll.u32 %s96_s6, 4  ;;  %s15_s7 = int_to_ptr.vmem [resolvable:$true] %s14_s7 }
   0x3   :  { %s60_s8 = scalar_lea.vmem %s15_s7, 256  ;;  %p65_p1 = scmp.lt.s32.totalorder %s15_s7, %s15_s7 }
   0x4   :  { %p61_p0 = scmp.ne.s32.totalorder %s15_s7, %s60_s8  ;;  %p66_p2 = scmp.lt.s32.totalorder %s60_s8, %s60_s8 }
   0x6   :  { %p67_p3 = por %p66_p2, %p65_p1 }
   0x8   :  { %p68_p4 = pnand %p67_p3, %p61_p0 }
   0xa   :  { %71 = shalt.err (!%p68_p4)
}
   0xb   :  { %17 = dma.hbm_to_vmem [thread:$0]  %s114_s0, 256, %s15_s7, [#allocation3]  }
   0xc   :  { %92 = dma.done.wait [#allocation3], 256  }
   0xd   :  { %93 = vsyncadd [#allocation3], 4294967040  ;;  %v21_v0 = vld [vmem:[#allocation2] sm:$0xff]  ;;  %v22_v1 = vld [vmem:[#allocation2 + $0x8] sm:$0xff]  ;;  %s97_s11 = smov [#allocation5]  }
   0xe   :  { %v23_v2 = vadd.f32 3.0, %v21_v0  ;;  %v24_v3 = vadd.f32 3.0, %v22_v1  ;;  %s41_s12 = sshll.u32 %s97_s11, 4  ;;  %s42_s12 = int_to_ptr.vmem [resolvable:$true] %s41_s12 }
   0xf   :  { %s72_s0 = scalar_lea.vmem %s42_s12, 256  ;;  %p77_p6 = scmp.lt.s32.totalorder %s42_s12, %s42_s12 }
  0x10   :  { %v25_v4 = vmul.f32 0.16666667, %v23_v2  ;;  %v26_v5 = vmul.f32 0.16666667, %v24_v3  ;;  %p73_p5 = scmp.ne.s32.totalorder %s42_s12, %s72_s0  ;;  %p78_p7 = scmp.lt.s32.totalorder %s72_s0, %s72_s0 }
  0x12   :  { %v27_v6 = vmax.f32 %v25_v4, 0.0  ;;  %v28_v7 = vmax.f32 %v26_v5, 0.0  ;;  %p79_p8 = por %p78_p7, %p77_p6 }
  0x14   :  { %v29_v8 = vmin.f32 %v27_v6, 1.0  ;;  %v30_v9 = vmin.f32 %v28_v7, 1.0  ;;  %p80_p9 = pnand %p79_p8, %p73_p5 }
  0x16   :  { %v31_v10 = vmul.f32 %v29_v8, %v21_v0  ;;  %v32_v11 = vmul.f32 %v30_v9, %v22_v1 }
  0x18   :  { %33 = vst [vmem:[#allocation5] sm:$0xff] %v31_v10  ;;  %34 = vst [vmem:[#allocation5 + $0x8] sm:$0xff] %v32_v11 }
  0x19   :  { %83 = shalt.err (!%p80_p9)
}
  0x1a   :  { %44 = dma.vmem_to_hbm [thread:$0]  %s42_s12, 256, %s115_s1, [#allocation4]  }
  0x1b   :  { %94 = dma.done.wait [#allocation4], 256  }
  0x1c   :  { %95 = vsyncadd [#allocation4], 4294967040 }
  0x1d   :  { %48 = vsyncpa [#allocation3], 1 }
  0x1e   :  { %49 = vsyncpa [#allocation4], 1 }

</bundles_post_ra>
